<compile_context>
chip_gen: v5e
topology: v5e:2x2
jax: 0.10.0
libtpu: 0.0.40
codegen_flags: <defaults>
</compile_context>

<pallas_src>
import math
import jax
import jax.numpy as jnp
import numpy as np
from jax.experimental import pallas as pl
from jax.experimental.pallas import tpu as pltpu


def drqn_kernel(x_ref, h0_ref, c0_ref,
                w1_ref, b1_ref,
                wih_ref, whh_ref, bg_ref,
                w2_ref, b2_ref,
                y_ref, hout_ref, cout_ref,
                hs_ref):
    TB, S = x_ref.shape
    B, H = h0_ref.shape
    T = TB // B
    f32 = jnp.float32

    # ---- Hoisted, batched (all timesteps at once) non-recurrent compute ----
    # Linear1 + ReLU over all T*B rows:  (T*B, S) @ (S, H) + b1
    x = x_ref[...].astype(f32)
    z1 = jnp.dot(x, w1_ref[...], preferred_element_type=f32) + b1_ref[...]
    z1 = jnp.maximum(z1, 0.0)
    # Input contribution to all LSTM gates, biases (b_ih + b_hh) folded in:
    #   (T*B, 4H) = relu(x W1 + b1) @ Wih^T + bg
    gates_x = jnp.dot(z1, wih_ref[...], preferred_element_type=f32) + bg_ref[...]

    whh = whh_ref[...]  # (H, 4H), hoisted load

    # ---- Recurrence: only h @ Whh stays on the serial path. ----
    h = h0_ref[...].astype(f32)
    c = c0_ref[...].astype(f32)
    for t in range(T):  # fully unrolled (T is a Python int), all offsets static
        gates = gates_x[t * B:(t + 1) * B, :] + jnp.dot(
            h, whh, preferred_element_type=f32)          # (B, 4H)
        # Nonlinearities on the full 128-lane gate vector, then static lane slices.
        sig = jax.nn.sigmoid(gates)
        th = jnp.tanh(gates)
        i_g = sig[:, 0 * H:1 * H]
        f_g = sig[:, 1 * H:2 * H]
        g_g = th[:, 2 * H:3 * H]
        o_g = sig[:, 3 * H:4 * H]
        c = f_g * c + i_g * g_g
        h = o_g * jnp.tanh(c)
        # Stage per-step hidden state into the lane-dense VMEM slab (scratch).
        hs_ref[t * B:(t + 1) * B, :] = h

    # ---- Hoisted Linear2: one (T*B, H) @ (H, A) matmul over all timesteps ----
    y = jnp.dot(hs_ref[...], w2_ref[...], preferred_element_type=f32) + b2_ref[...]

    # Single end-of-kernel writebacks.
    y_ref[...] = y.astype(y_ref.dtype)
    hout_ref[...] = h.astype(hout_ref.dtype)
    cout_ref[...] = c.astype(cout_ref.dtype)


def drqn_forward(x, h0, c0, params):
    """x: (B, T, S) f32; h0, c0: (1, B, H) f32. Returns (y (B,T,A), new_h, new_c)."""
    B, T, S = x.shape
    H = h0.shape[-1]
    A = params["w2"].shape[-1]

    # Layout plumbing outside the kernel (tiny XLA ops): time-major 2-D slab so
    # the rows of timestep t are contiguous ([t*B, (t+1)*B)).
    x2d = jnp.transpose(x, (1, 0, 2)).reshape(T * B, S)

    vmem = lambda: pl.BlockSpec(memory_space=pltpu.MemorySpace.VMEM)

    y2d, hout, cout = pl.pallas_call(
        drqn_kernel,
        out_shape=(
            jax.ShapeDtypeStruct((T * B, A), x.dtype),
            jax.ShapeDtypeStruct((B, H), x.dtype),
            jax.ShapeDtypeStruct((B, H), x.dtype),
        ),
        in_specs=[vmem() for _ in range(10)],
        out_specs=(vmem(), vmem(), vmem()),
        scratch_shapes=[pltpu.VMEM((T * B, H), jnp.float32)],  # staged hidden states
    )(x2d, h0[0], c0[0],
      params["w1"], params["b1"],
      params["wih"], params["whh"], params["bg"],
      params["w2"], params["b2"])

    y = jnp.transpose(y2d.reshape(T, B, A), (1, 0, 2))
    return y, hout[None], cout[None]


def init_params(key, state_space, action_space):
    """Deterministic synthetic parameters matching DRQN.__init__ shapes."""
    H, S, A = state_space, state_space, action_space
    ks = jax.random.split(key, 8)

    def xavier(k, fan_in, fan_out):
        bound = math.sqrt(6.0 / (fan_in + fan_out))
        # PyTorch Linear weight is (out, in); we store transposed (in, out).
        return jax.random.uniform(k, (fan_in, fan_out), jnp.float32, -bound, bound)

    def unif(k, shape, fan):
        bound = 1.0 / math.sqrt(fan)
        return jax.random.uniform(k, shape, jnp.float32, -bound, bound)

    params = {
        "w1": xavier(ks[0], S, H),                 # Linear1.weight^T
        "b1": unif(ks[1], (1, H), S),              # Linear1.bias
        "wih": unif(ks[2], (H, 4 * H), H),         # lstm.weight_ih_l0^T (gate order i,f,g,o)
        "whh": unif(ks[3], (H, 4 * H), H),         # lstm.weight_hh_l0^T
        "bg": unif(ks[4], (1, 4 * H), H) + unif(ks[5], (1, 4 * H), H),  # b_ih + b_hh
        "w2": xavier(ks[6], H, A),                 # Linear2.weight^T
        "b2": unif(ks[7], (1, A), H),              # Linear2.bias
    }
    return params


def drqn_reference(x, h0, c0, p):
    """Pure-JAX reference for correctness check."""
    B, T, S = x.shape
    H = h0.shape[-1]
    hp = jax.lax.Precision.HIGHEST
    z = jnp.maximum(jnp.einsum("bts,sh->bth", x, p["w1"], precision=hp) + p["b1"][0], 0.0)
    h = h0[0]
    c = c0[0]
    ys = []
    for t in range(T):
        g = (jnp.dot(z[:, t], p["wih"], precision=hp)
             + jnp.dot(h, p["whh"], precision=hp) + p["bg"][0])
        i = jax.nn.sigmoid(g[:, 0 * H:1 * H])
        f = jax.nn.sigmoid(g[:, 1 * H:2 * H])
        gg = jnp.tanh(g[:, 2 * H:3 * H])
        o = jax.nn.sigmoid(g[:, 3 * H:4 * H])
        c = f * c + i * gg
        h = o * jnp.tanh(c)
        ys.append(jnp.dot(h, p["w2"], precision=hp) + p["b2"][0])
    y = jnp.stack(ys, axis=1)
    return y, h[None], c[None]


if __name__ == "__main__":
    state_space = 32   # -> hidden_space = 32
    action_space = 4
    B, T = 2, 8

    key = jax.random.PRNGKey(0)
    k_x, k_p = jax.random.split(key)
    params = init_params(k_p, state_space, action_space)

    x = jax.random.normal(k_x, (B, T, state_space), jnp.float32)
    h0 = jnp.zeros((1, B, state_space), jnp.float32)
    c0 = jnp.zeros((1, B, state_space), jnp.float32)

    y, new_h, new_c = jax.jit(drqn_forward)(x, h0, c0, params)
    jax.block_until_ready((y, new_h, new_c))

    y_ref, h_ref, c_ref = drqn_reference(x, h0, c0, params)
    np.testing.assert_allclose(np.asarray(y), np.asarray(y_ref), atol=1e-2, rtol=1e-2)
    np.testing.assert_allclose(np.asarray(new_h), np.asarray(h_ref), atol=1e-2, rtol=1e-2)
    np.testing.assert_allclose(np.asarray(new_c), np.asarray(c_ref), atol=1e-2, rtol=1e-2)

    assert y.shape == (B, T, action_space)
    assert new_h.shape == (1, B, state_space)
    assert new_c.shape == (1, B, state_space)
    print("KERNEL_OK")
</pallas_src>

<mosaic_0001>
module attributes {stable_mosaic.version = 11 : i64} {
  func.func @drqn_kernel(%arg0: memref<16x32xf32, #tpu.memory_space<vmem>>, %arg1: memref<2x32xf32, #tpu.memory_space<vmem>>, %arg2: memref<2x32xf32, #tpu.memory_space<vmem>>, %arg3: memref<32x32xf32, #tpu.memory_space<vmem>>, %arg4: memref<1x32xf32, #tpu.memory_space<vmem>>, %arg5: memref<32x128xf32, #tpu.memory_space<vmem>>, %arg6: memref<32x128xf32, #tpu.memory_space<vmem>>, %arg7: memref<1x128xf32, #tpu.memory_space<vmem>>, %arg8: memref<32x4xf32, #tpu.memory_space<vmem>>, %arg9: memref<1x4xf32, #tpu.memory_space<vmem>>, %arg10: memref<16x4xf32, #tpu.memory_space<vmem>>, %arg11: memref<2x32xf32, #tpu.memory_space<vmem>>, %arg12: memref<2x32xf32, #tpu.memory_space<vmem>>, %arg13: memref<16x32xf32, #tpu.memory_space<vmem>>) attributes {dimension_semantics = [], scalar_prefetch = 0 : i64, scratch_operands = 1 : i64, tpu.core_type = #tpu.core_type<tc>} {
    %c0 = arith.constant 0 : index
    %c0_0 = arith.constant 0 : index
    %0 = vector.load %arg0[%c0, %c0_0] : memref<16x32xf32, #tpu.memory_space<vmem>>, vector<16x32xf32>
    %c0_1 = arith.constant 0 : index
    %c0_2 = arith.constant 0 : index
    %1 = vector.load %arg3[%c0_1, %c0_2] : memref<32x32xf32, #tpu.memory_space<vmem>>, vector<32x32xf32>
    %cst = arith.constant dense<0.000000e+00> : vector<16x32xf32>
    %2 = tpu.matmul %0, %1, %cst {dimension_numbers = #tpu.dot_dimension_numbers<[1], [0], [0], [1], [0, 0, 1, 1], [], []>} : vector<16x32xf32>, vector<32x32xf32>, vector<16x32xf32> -> vector<16x32xf32>
    %c0_3 = arith.constant 0 : index
    %c0_4 = arith.constant 0 : index
    %3 = vector.load %arg4[%c0_3, %c0_4] : memref<1x32xf32, #tpu.memory_space<vmem>>, vector<1x32xf32>
    %4 = vector.broadcast %3 : vector<1x32xf32> to vector<16x32xf32>
    %5 = arith.addf %2, %4 : vector<16x32xf32>
    %cst_5 = arith.constant 0.000000e+00 : f32
    %6 = vector.broadcast %cst_5 : f32 to vector<16x32xf32>
    %7 = arith.maximumf %5, %6 : vector<16x32xf32>
    %c0_6 = arith.constant 0 : index
    %c0_7 = arith.constant 0 : index
    %8 = vector.load %arg5[%c0_6, %c0_7] : memref<32x128xf32, #tpu.memory_space<vmem>>, vector<32x128xf32>
    %cst_8 = arith.constant dense<0.000000e+00> : vector<16x128xf32>
    %9 = tpu.matmul %7, %8, %cst_8 {dimension_numbers = #tpu.dot_dimension_numbers<[1], [0], [0], [1], [0, 0, 1, 1], [], []>} : vector<16x32xf32>, vector<32x128xf32>, vector<16x128xf32> -> vector<16x128xf32>
    %c0_9 = arith.constant 0 : index
    %c0_10 = arith.constant 0 : index
    %10 = vector.load %arg7[%c0_9, %c0_10] : memref<1x128xf32, #tpu.memory_space<vmem>>, vector<1x128xf32>
    %11 = vector.broadcast %10 : vector<1x128xf32> to vector<16x128xf32>
    %12 = arith.addf %9, %11 : vector<16x128xf32>
    %c0_11 = arith.constant 0 : index
    %c0_12 = arith.constant 0 : index
    %13 = vector.load %arg6[%c0_11, %c0_12] : memref<32x128xf32, #tpu.memory_space<vmem>>, vector<32x128xf32>
    %c0_13 = arith.constant 0 : index
    %c0_14 = arith.constant 0 : index
    %14 = vector.load %arg1[%c0_13, %c0_14] : memref<2x32xf32, #tpu.memory_space<vmem>>, vector<2x32xf32>
    %c0_15 = arith.constant 0 : index
    %c0_16 = arith.constant 0 : index
    %15 = vector.load %arg2[%c0_15, %c0_16] : memref<2x32xf32, #tpu.memory_space<vmem>>, vector<2x32xf32>
    %16 = vector.extract_strided_slice %12 {offsets = [0, 0], sizes = [2, 128], strides = [1, 1]} : vector<16x128xf32> to vector<2x128xf32>
    %cst_17 = arith.constant dense<0.000000e+00> : vector<2x128xf32>
    %17 = tpu.matmul %14, %13, %cst_17 {dimension_numbers = #tpu.dot_dimension_numbers<[1], [0], [0], [1], [0, 0, 1, 1], [], []>} : vector<2x32xf32>, vector<32x128xf32>, vector<2x128xf32> -> vector<2x128xf32>
    %18 = arith.addf %16, %17 : vector<2x128xf32>
    %19 = arith.negf %18 : vector<2x128xf32>
    %20 = math.exp %19 : vector<2x128xf32>
    %cst_18 = arith.constant 1.000000e+00 : f32
    %21 = vector.broadcast %cst_18 : f32 to vector<2x128xf32>
    %22 = arith.addf %21, %20 : vector<2x128xf32>
    %23 = arith.divf %21, %22 : vector<2x128xf32>
    %24 = math.tanh %18 : vector<2x128xf32>
    %25 = vector.extract_strided_slice %23 {offsets = [0, 0], sizes = [2, 32], strides = [1, 1]} : vector<2x128xf32> to vector<2x32xf32>
    %26 = vector.extract_strided_slice %23 {offsets = [0, 32], sizes = [2, 32], strides = [1, 1]} : vector<2x128xf32> to vector<2x32xf32>
    %27 = vector.extract_strided_slice %24 {offsets = [0, 64], sizes = [2, 32], strides = [1, 1]} : vector<2x128xf32> to vector<2x32xf32>
    %28 = vector.extract_strided_slice %23 {offsets = [0, 96], sizes = [2, 32], strides = [1, 1]} : vector<2x128xf32> to vector<2x32xf32>
    %29 = arith.mulf %26, %15 : vector<2x32xf32>
    %30 = arith.mulf %25, %27 : vector<2x32xf32>
    %31 = arith.addf %29, %30 : vector<2x32xf32>
    %32 = math.tanh %31 : vector<2x32xf32>
    %33 = arith.mulf %28, %32 : vector<2x32xf32>
    %c0_19 = arith.constant 0 : index
    %c0_20 = arith.constant 0 : index
    %34 = vector.load %arg13[%c0_19, %c0_20] : memref<16x32xf32, #tpu.memory_space<vmem>>, vector<2x32xf32>
    tpu.vector_store %arg13[%c0_19, %c0_20], %33 {strides = array<i32>} : memref<16x32xf32, #tpu.memory_space<vmem>>, vector<2x32xf32>,
    %35 = vector.extract_strided_slice %12 {offsets = [2, 0], sizes = [2, 128], strides = [1, 1]} : vector<16x128xf32> to vector<2x128xf32>
    %cst_21 = arith.constant dense<0.000000e+00> : vector<2x128xf32>
    %36 = tpu.matmul %33, %13, %cst_21 {dimension_numbers = #tpu.dot_dimension_numbers<[1], [0], [0], [1], [0, 0, 1, 1], [], []>} : vector<2x32xf32>, vector<32x128xf32>, vector<2x128xf32> -> vector<2x128xf32>
    %37 = arith.addf %35, %36 : vector<2x128xf32>
    %38 = arith.negf %37 : vector<2x128xf32>
    %39 = math.exp %38 : vector<2x128xf32>
    %cst_22 = arith.constant 1.000000e+00 : f32
    %40 = vector.broadcast %cst_22 : f32 to vector<2x128xf32>
    %41 = arith.addf %40, %39 : vector<2x128xf32>
    %42 = arith.divf %40, %41 : vector<2x128xf32>
    %43 = math.tanh %37 : vector<2x128xf32>
    %44 = vector.extract_strided_slice %42 {offsets = [0, 0], sizes = [2, 32], strides = [1, 1]} : vector<2x128xf32> to vector<2x32xf32>
    %45 = vector.extract_strided_slice %42 {offsets = [0, 32], sizes = [2, 32], strides = [1, 1]} : vector<2x128xf32> to vector<2x32xf32>
    %46 = vector.extract_strided_slice %43 {offsets = [0, 64], sizes = [2, 32], strides = [1, 1]} : vector<2x128xf32> to vector<2x32xf32>
    %47 = vector.extract_strided_slice %42 {offsets = [0, 96], sizes = [2, 32], strides = [1, 1]} : vector<2x128xf32> to vector<2x32xf32>
    %48 = arith.mulf %45, %31 : vector<2x32xf32>
    %49 = arith.mulf %44, %46 : vector<2x32xf32>
    %50 = arith.addf %48, %49 : vector<2x32xf32>
    %51 = math.tanh %50 : vector<2x32xf32>
    %52 = arith.mulf %47, %51 : vector<2x32xf32>
    %c2 = arith.constant 2 : index
    %c0_23 = arith.constant 0 : index
    %53 = vector.load %arg13[%c2, %c0_23] : memref<16x32xf32, #tpu.memory_space<vmem>>, vector<2x32xf32>
    tpu.vector_store %arg13[%c2, %c0_23], %52 {strides = array<i32>} : memref<16x32xf32, #tpu.memory_space<vmem>>, vector<2x32xf32>,
    %54 = vector.extract_strided_slice %12 {offsets = [4, 0], sizes = [2, 128], strides = [1, 1]} : vector<16x128xf32> to vector<2x128xf32>
    %cst_24 = arith.constant dense<0.000000e+00> : vector<2x128xf32>
    %55 = tpu.matmul %52, %13, %cst_24 {dimension_numbers = #tpu.dot_dimension_numbers<[1], [0], [0], [1], [0, 0, 1, 1], [], []>} : vector<2x32xf32>, vector<32x128xf32>, vector<2x128xf32> -> vector<2x128xf32>
    %56 = arith.addf %54, %55 : vector<2x128xf32>
    %57 = arith.negf %56 : vector<2x128xf32>
    %58 = math.exp %57 : vector<2x128xf32>
    %cst_25 = arith.constant 1.000000e+00 : f32
    %59 = vector.broadcast %cst_25 : f32 to vector<2x128xf32>
    %60 = arith.addf %59, %58 : vector<2x128xf32>
    %61 = arith.divf %59, %60 : vector<2x128xf32>
    %62 = math.tanh %56 : vector<2x128xf32>
    %63 = vector.extract_strided_slice %61 {offsets = [0, 0], sizes = [2, 32], strides = [1, 1]} : vector<2x128xf32> to vector<2x32xf32>
    %64 = vector.extract_strided_slice %61 {offsets = [0, 32], sizes = [2, 32], strides = [1, 1]} : vector<2x128xf32> to vector<2x32xf32>
    %65 = vector.extract_strided_slice %62 {offsets = [0, 64], sizes = [2, 32], strides = [1, 1]} : vector<2x128xf32> to vector<2x32xf32>
    %66 = vector.extract_strided_slice %61 {offsets = [0, 96], sizes = [2, 32], strides = [1, 1]} : vector<2x128xf32> to vector<2x32xf32>
    %67 = arith.mulf %64, %50 : vector<2x32xf32>
    %68 = arith.mulf %63, %65 : vector<2x32xf32>
    %69 = arith.addf %67, %68 : vector<2x32xf32>
    %70 = math.tanh %69 : vector<2x32xf32>
    %71 = arith.mulf %66, %70 : vector<2x32xf32>
    %c4 = arith.constant 4 : index
    %c0_26 = arith.constant 0 : index
    %72 = vector.load %arg13[%c4, %c0_26] : memref<16x32xf32, #tpu.memory_space<vmem>>, vector<2x32xf32>
    tpu.vector_store %arg13[%c4, %c0_26], %71 {strides = array<i32>} : memref<16x32xf32, #tpu.memory_space<vmem>>, vector<2x32xf32>,
    %73 = vector.extract_strided_slice %12 {offsets = [6, 0], sizes = [2, 128], strides = [1, 1]} : vector<16x128xf32> to vector<2x128xf32>
    %cst_27 = arith.constant dense<0.000000e+00> : vector<2x128xf32>
    %74 = tpu.matmul %71, %13, %cst_27 {dimension_numbers = #tpu.dot_dimension_numbers<[1], [0], [0], [1], [0, 0, 1, 1], [], []>} : vector<2x32xf32>, vector<32x128xf32>, vector<2x128xf32> -> vector<2x128xf32>
    %75 = arith.addf %73, %74 : vector<2x128xf32>
    %76 = arith.negf %75 : vector<2x128xf32>
    %77 = math.exp %76 : vector<2x128xf32>
    %cst_28 = arith.constant 1.000000e+00 : f32
    %78 = vector.broadcast %cst_28 : f32 to vector<2x128xf32>
    %79 = arith.addf %78, %77 : vector<2x128xf32>
    %80 = arith.divf %78, %79 : vector<2x128xf32>
    %81 = math.tanh %75 : vector<2x128xf32>
    %82 = vector.extract_strided_slice %80 {offsets = [0, 0], sizes = [2, 32], strides = [1, 1]} : vector<2x128xf32> to vector<2x32xf32>
    %83 = vector.extract_strided_slice %80 {offsets = [0, 32], sizes = [2, 32], strides = [1, 1]} : vector<2x128xf32> to vector<2x32xf32>
    %84 = vector.extract_strided_slice %81 {offsets = [0, 64], sizes = [2, 32], strides = [1, 1]} : vector<2x128xf32> to vector<2x32xf32>
    %85 = vector.extract_strided_slice %80 {offsets = [0, 96], sizes = [2, 32], strides = [1, 1]} : vector<2x128xf32> to vector<2x32xf32>
    %86 = arith.mulf %83, %69 : vector<2x32xf32>
    %87 = arith.mulf %82, %84 : vector<2x32xf32>
    %88 = arith.addf %86, %87 : vector<2x32xf32>
    %89 = math.tanh %88 : vector<2x32xf32>
    %90 = arith.mulf %85, %89 : vector<2x32xf32>
    %c6 = arith.constant 6 : index
    %c0_29 = arith.constant 0 : index
    %91 = vector.load %arg13[%c6, %c0_29] : memref<16x32xf32, #tpu.memory_space<vmem>>, vector<2x32xf32>
    tpu.vector_store %arg13[%c6, %c0_29], %90 {strides = array<i32>} : memref<16x32xf32, #tpu.memory_space<vmem>>, vector<2x32xf32>,
    %92 = vector.extract_strided_slice %12 {offsets = [8, 0], sizes = [2, 128], strides = [1, 1]} : vector<16x128xf32> to vector<2x128xf32>
    %cst_30 = arith.constant dense<0.000000e+00> : vector<2x128xf32>
    %93 = tpu.matmul %90, %13, %cst_30 {dimension_numbers = #tpu.dot_dimension_numbers<[1], [0], [0], [1], [0, 0, 1, 1], [], []>} : vector<2x32xf32>, vector<32x128xf32>, vector<2x128xf32> -> vector<2x128xf32>
    %94 = arith.addf %92, %93 : vector<2x128xf32>
    %95 = arith.negf %94 : vector<2x128xf32>
    %96 = math.exp %95 : vector<2x128xf32>
    %cst_31 = arith.constant 1.000000e+00 : f32
    %97 = vector.broadcast %cst_31 : f32 to vector<2x128xf32>
    %98 = arith.addf %97, %96 : vector<2x128xf32>
    %99 = arith.divf %97, %98 : vector<2x128xf32>
    %100 = math.tanh %94 : vector<2x128xf32>
    %101 = vector.extract_strided_slice %99 {offsets = [0, 0], sizes = [2, 32], strides = [1, 1]} : vector<2x128xf32> to vector<2x32xf32>
    %102 = vector.extract_strided_slice %99 {offsets = [0, 32], sizes = [2, 32], strides = [1, 1]} : vector<2x128xf32> to vector<2x32xf32>
    %103 = vector.extract_strided_slice %100 {offsets = [0, 64], sizes = [2, 32], strides = [1, 1]} : vector<2x128xf32> to vector<2x32xf32>
    %104 = vector.extract_strided_slice %99 {offsets = [0, 96], sizes = [2, 32], strides = [1, 1]} : vector<2x128xf32> to vector<2x32xf32>
    %105 = arith.mulf %102, %88 : vector<2x32xf32>
    %106 = arith.mulf %101, %103 : vector<2x32xf32>
    %107 = arith.addf %105, %106 : vector<2x32xf32>
    %108 = math.tanh %107 : vector<2x32xf32>
    %109 = arith.mulf %104, %108 : vector<2x32xf32>
    %c8 = arith.constant 8 : index
    %c0_32 = arith.constant 0 : index
    %110 = vector.load %arg13[%c8, %c0_32] : memref<16x32xf32, #tpu.memory_space<vmem>>, vector<2x32xf32>
    tpu.vector_store %arg13[%c8, %c0_32], %109 {strides = array<i32>} : memref<16x32xf32, #tpu.memory_space<vmem>>, vector<2x32xf32>,
    %111 = vector.extract_strided_slice %12 {offsets = [10, 0], sizes = [2, 128], strides = [1, 1]} : vector<16x128xf32> to vector<2x128xf32>
    %cst_33 = arith.constant dense<0.000000e+00> : vector<2x128xf32>
    %112 = tpu.matmul %109, %13, %cst_33 {dimension_numbers = #tpu.dot_dimension_numbers<[1], [0], [0], [1], [0, 0, 1, 1], [], []>} : vector<2x32xf32>, vector<32x128xf32>, vector<2x128xf32> -> vector<2x128xf32>
    %113 = arith.addf %111, %112 : vector<2x128xf32>
    %114 = arith.negf %113 : vector<2x128xf32>
    %115 = math.exp %114 : vector<2x128xf32>
    %cst_34 = arith.constant 1.000000e+00 : f32
    %116 = vector.broadcast %cst_34 : f32 to vector<2x128xf32>
    %117 = arith.addf %116, %115 : vector<2x128xf32>
    %118 = arith.divf %116, %117 : vector<2x128xf32>
    %119 = math.tanh %113 : vector<2x128xf32>
    %120 = vector.extract_strided_slice %118 {offsets = [0, 0], sizes = [2, 32], strides = [1, 1]} : vector<2x128xf32> to vector<2x32xf32>
    %121 = vector.extract_strided_slice %118 {offsets = [0, 32], sizes = [2, 32], strides = [1, 1]} : vector<2x128xf32> to vector<2x32xf32>
    %122 = vector.extract_strided_slice %119 {offsets = [0, 64], sizes = [2, 32], strides = [1, 1]} : vector<2x128xf32> to vector<2x32xf32>
    %123 = vector.extract_strided_slice %118 {offsets = [0, 96], sizes = [2, 32], strides = [1, 1]} : vector<2x128xf32> to vector<2x32xf32>
    %124 = arith.mulf %121, %107 : vector<2x32xf32>
    %125 = arith.mulf %120, %122 : vector<2x32xf32>
    %126 = arith.addf %124, %125 : vector<2x32xf32>
    %127 = math.tanh %126 : vector<2x32xf32>
    %128 = arith.mulf %123, %127 : vector<2x32xf32>
    %c10 = arith.constant 10 : index
    %c0_35 = arith.constant 0 : index
    %129 = vector.load %arg13[%c10, %c0_35] : memref<16x32xf32, #tpu.memory_space<vmem>>, vector<2x32xf32>
    tpu.vector_store %arg13[%c10, %c0_35], %128 {strides = array<i32>} : memref<16x32xf32, #tpu.memory_space<vmem>>, vector<2x32xf32>,
    %130 = vector.extract_strided_slice %12 {offsets = [12, 0], sizes = [2, 128], strides = [1, 1]} : vector<16x128xf32> to vector<2x128xf32>
    %cst_36 = arith.constant dense<0.000000e+00> : vector<2x128xf32>
    %131 = tpu.matmul %128, %13, %cst_36 {dimension_numbers = #tpu.dot_dimension_numbers<[1], [0], [0], [1], [0, 0, 1, 1], [], []>} : vector<2x32xf32>, vector<32x128xf32>, vector<2x128xf32> -> vector<2x128xf32>
    %132 = arith.addf %130, %131 : vector<2x128xf32>
    %133 = arith.negf %132 : vector<2x128xf32>
    %134 = math.exp %133 : vector<2x128xf32>
    %cst_37 = arith.constant 1.000000e+00 : f32
    %135 = vector.broadcast %cst_37 : f32 to vector<2x128xf32>
    %136 = arith.addf %135, %134 : vector<2x128xf32>
    %137 = arith.divf %135, %136 : vector<2x128xf32>
    %138 = math.tanh %132 : vector<2x128xf32>
    %139 = vector.extract_strided_slice %137 {offsets = [0, 0], sizes = [2, 32], strides = [1, 1]} : vector<2x128xf32> to vector<2x32xf32>
    %140 = vector.extract_strided_slice %137 {offsets = [0, 32], sizes = [2, 32], strides = [1, 1]} : vector<2x128xf32> to vector<2x32xf32>
    %141 = vector.extract_strided_slice %138 {offsets = [0, 64], sizes = [2, 32], strides = [1, 1]} : vector<2x128xf32> to vector<2x32xf32>
    %142 = vector.extract_strided_slice %137 {offsets = [0, 96], sizes = [2, 32], strides = [1, 1]} : vector<2x128xf32> to vector<2x32xf32>
    %143 = arith.mulf %140, %126 : vector<2x32xf32>
    %144 = arith.mulf %139, %141 : vector<2x32xf32>
    %145 = arith.addf %143, %144 : vector<2x32xf32>
    %146 = math.tanh %145 : vector<2x32xf32>
    %147 = arith.mulf %142, %146 : vector<2x32xf32>
    %c12 = arith.constant 12 : index
    %c0_38 = arith.constant 0 : index
    %148 = vector.load %arg13[%c12, %c0_38] : memref<16x32xf32, #tpu.memory_space<vmem>>, vector<2x32xf32>
    tpu.vector_store %arg13[%c12, %c0_38], %147 {strides = array<i32>} : memref<16x32xf32, #tpu.memory_space<vmem>>, vector<2x32xf32>,
    %149 = vector.extract_strided_slice %12 {offsets = [14, 0], sizes = [2, 128], strides = [1, 1]} : vector<16x128xf32> to vector<2x128xf32>
    %cst_39 = arith.constant dense<0.000000e+00> : vector<2x128xf32>
    %150 = tpu.matmul %147, %13, %cst_39 {dimension_numbers = #tpu.dot_dimension_numbers<[1], [0], [0], [1], [0, 0, 1, 1], [], []>} : vector<2x32xf32>, vector<32x128xf32>, vector<2x128xf32> -> vector<2x128xf32>
    %151 = arith.addf %149, %150 : vector<2x128xf32>
    %152 = arith.negf %151 : vector<2x128xf32>
    %153 = math.exp %152 : vector<2x128xf32>
    %cst_40 = arith.constant 1.000000e+00 : f32
    %154 = vector.broadcast %cst_40 : f32 to vector<2x128xf32>
    %155 = arith.addf %154, %153 : vector<2x128xf32>
    %156 = arith.divf %154, %155 : vector<2x128xf32>
    %157 = math.tanh %151 : vector<2x128xf32>
    %158 = vector.extract_strided_slice %156 {offsets = [0, 0], sizes = [2, 32], strides = [1, 1]} : vector<2x128xf32> to vector<2x32xf32>
    %159 = vector.extract_strided_slice %156 {offsets = [0, 32], sizes = [2, 32], strides = [1, 1]} : vector<2x128xf32> to vector<2x32xf32>
    %160 = vector.extract_strided_slice %157 {offsets = [0, 64], sizes = [2, 32], strides = [1, 1]} : vector<2x128xf32> to vector<2x32xf32>
    %161 = vector.extract_strided_slice %156 {offsets = [0, 96], sizes = [2, 32], strides = [1, 1]} : vector<2x128xf32> to vector<2x32xf32>
    %162 = arith.mulf %159, %145 : vector<2x32xf32>
    %163 = arith.mulf %158, %160 : vector<2x32xf32>
    %164 = arith.addf %162, %163 : vector<2x32xf32>
    %165 = math.tanh %164 : vector<2x32xf32>
    %166 = arith.mulf %161, %165 : vector<2x32xf32>
    %c14 = arith.constant 14 : index
    %c0_41 = arith.constant 0 : index
    %167 = vector.load %arg13[%c14, %c0_41] : memref<16x32xf32, #tpu.memory_space<vmem>>, vector<2x32xf32>
    tpu.vector_store %arg13[%c14, %c0_41], %166 {strides = array<i32>} : memref<16x32xf32, #tpu.memory_space<vmem>>, vector<2x32xf32>,
    %c0_42 = arith.constant 0 : index
    %c0_43 = arith.constant 0 : index
    %168 = vector.load %arg13[%c0_42, %c0_43] : memref<16x32xf32, #tpu.memory_space<vmem>>, vector<16x32xf32>
    %c0_44 = arith.constant 0 : index
    %c0_45 = arith.constant 0 : index
    %169 = vector.load %arg8[%c0_44, %c0_45] : memref<32x4xf32, #tpu.memory_space<vmem>>, vector<32x4xf32>
    %cst_46 = arith.constant dense<0.000000e+00> : vector<16x4xf32>
    %170 = tpu.matmul %168, %169, %cst_46 {dimension_numbers = #tpu.dot_dimension_numbers<[1], [0], [0], [1], [0, 0, 1, 1], [], []>} : vector<16x32xf32>, vector<32x4xf32>, vector<16x4xf32> -> vector<16x4xf32>
    %c0_47 = arith.constant 0 : index
    %c0_48 = arith.constant 0 : index
    %171 = vector.load %arg9[%c0_47, %c0_48] : memref<1x4xf32, #tpu.memory_space<vmem>>, vector<1x4xf32>
    %172 = vector.broadcast %171 : vector<1x4xf32> to vector<16x4xf32>
    %173 = arith.addf %170, %172 : vector<16x4xf32>
    %c0_49 = arith.constant 0 : index
    %c0_50 = arith.constant 0 : index
    %174 = vector.load %arg10[%c0_49, %c0_50] : memref<16x4xf32, #tpu.memory_space<vmem>>, vector<16x4xf32>
    tpu.vector_store %arg10[%c0_49, %c0_50], %173 {strides = array<i32>} : memref<16x4xf32, #tpu.memory_space<vmem>>, vector<16x4xf32>,
    %c0_51 = arith.constant 0 : index
    %c0_52 = arith.constant 0 : index
    %175 = vector.load %arg11[%c0_51, %c0_52] : memref<2x32xf32, #tpu.memory_space<vmem>>, vector<2x32xf32>
    tpu.vector_store %arg11[%c0_51, %c0_52], %166 {strides = array<i32>} : memref<2x32xf32, #tpu.memory_space<vmem>>, vector<2x32xf32>,
    %c0_53 = arith.constant 0 : index
    %c0_54 = arith.constant 0 : index
    %176 = vector.load %arg12[%c0_53, %c0_54] : memref<2x32xf32, #tpu.memory_space<vmem>>, vector<2x32xf32>
    tpu.vector_store %arg12[%c0_53, %c0_54], %164 {strides = array<i32>} : memref<2x32xf32, #tpu.memory_space<vmem>>, vector<2x32xf32>,
    return
  }
}

</mosaic_0001>

<bundles_post_ra>
// kernel: drqn_forward.1
= control target key start
LH: loop header
LB: loop body
LE: loop exit
PB: predicated region body
PF: predicated region fallthrough
CT: control target
= control target key end

     0   :  { %18 = vsyncpa [#allocation4], 0  ;;  %s1259_s0 = inlined_call_operand.vmem [shape: f32[16,32], index: 0, kind: input, shape index: {}]   ;;  %s1260_s1 = inlined_call_operand.vmem [shape: f32[2,32], index: 1, kind: input, shape index: {}]   ;;  %s1261_s2 = inlined_call_operand.vmem [shape: f32[2,32], index: 2, kind: input, shape index: {}]   ;;  %s1262_s3 = inlined_call_operand.vmem [shape: f32[32,32], index: 3, kind: input, shape index: {}]   ;;  %s1263_s4 = inlined_call_operand.vmem [shape: f32[1,32], index: 4, kind: input, shape index: {}]   ;;  %s1264_s5 = inlined_call_operand.vmem [shape: f32[32,128], index: 5, kind: input, shape index: {}]   ;;  %s1265_s6 = inlined_call_operand.hbm [shape: f32[32,128], index: 6, kind: input, shape index: {}]   ;;  %s1266_s7 = inlined_call_operand.vmem [shape: f32[1,128], index: 7, kind: input, shape index: {}]   ;;  %s1267_s8 = inlined_call_operand.vmem [shape: f32[32,4], index: 8, kind: input, shape index: {}]   ;;  %s1268_s9 = inlined_call_operand.vmem [shape: f32[1,4], index: 9, kind: input, shape index: {}]   ;;  %s1269_s10 = inlined_call_operand.vmem [shape: f32[16,4], index: 10, kind: output, shape index: {0}]   ;;  %s1270_s11 = inlined_call_operand.hbm [shape: f32[2,32], index: 11, kind: output, shape index: {1}]   ;;  %s1271_s12 = inlined_call_operand.hbm [shape: f32[2,32], index: 12, kind: output, shape index: {2}]  }
   0x1   :  { %19 = vsyncpa [#allocation5], 0 }
   0x2   :  { %20 = vsyncpa [#allocation8], 0  ;;  %s37_s23 = sshll.u32 %s1265_s6, 4  ;;  %s988_s24 = smov [#allocation3]   ;;  %s38_s23 = int_to_ptr.hbm [resolvable:$true] %s37_s23 }
   0x3   :  { %s39_s25 = sshll.u32 %s988_s24, 4  ;;  %s989_s26 = smov 128   ;;  %s40_s25 = int_to_ptr.vmem [resolvable:$true] %s39_s25 }
   0x4   :  { %s990_s27 = smov 8  }
   0x5   :  { %45 = dma.hbm_to_vmem [thread:$0]  %s38_s23, 512, %s40_s25, [#allocation4], %s989_s26, %s989_s26, %s990_s27  }
   0x6   :  { %982 = dma.done.wait [#allocation4], 512  }
   0x7   :  { %983 = vsyncadd [#allocation4], 4294966784  ;;  %v61_v0 = vld [vmem:[%s1262_s3 + $0x18] sm:$0xff]  ;;  %v60_v1 = vld [vmem:[%s1262_s3 + $0x10] sm:$0xff]  ;;  %vm66_vm0 = vcmask 261120   ;;  %s992_s14 = smov 32  }
   0x8   :  { %85 = vmatpush.msra.mxu0 %v61_v0  ;;  %831 = vmatpush.msra.mxu1 %v61_v0  ;;  %v1070_v2 = vld [vmem:[#allocation3 + $0x18] sm:$0xff]  ;;  %v1076_v4 = vld [vmem:[#allocation3 + $0x10] sm:$0xff]  ;;  %v1079_v5 = vld [vmem:[#allocation3 + $0x8] sm:$0xff]  ;;  %vm210_vm5 = vcmask 254976   ;;  %s994_s22 = smov [#allocation6]   ;;  %s995_s24 = smov [#allocation7]  }
   0x9   :  { %v59_v3 = vld [vmem:[%s1262_s3 + $0x8] sm:$0xff]  ;;  %156 = vmatpush.msra.mxu2 %v1070_v2  ;;  %226 = vmatpush.msra.mxu3 %v1070_v2  ;;  %v58_v6 = vld [vmem:[%s1262_s3] sm:$0xff]  ;;  %v101_v9 = vld [vmem:[%s1264_s5 + $0x18] sm:$0xff]  ;;  %s790_s25 = sshll.u32 %s995_s24, 4  ;;  %s792_s28 = sshll.u32 %s1271_s12, 4  ;;  %s791_s25 = int_to_ptr.vmem [resolvable:$true] %s790_s25  ;;  %s793_s28 = int_to_ptr.hbm [resolvable:$true] %s792_s28 }
   0xa   :  { %86 = vmatpush.msra.mxu0 %v60_v1  ;;  %832 = vmatpush.msra.mxu1 %v60_v1  ;;  %v56_v7 = vld [vmem:[%s1259_s0] sm:$0xff]  ;;  %v57_v8 = vld [vmem:[%s1259_s0 + $0x8] sm:$0xff]  ;;  %v100_v10 = vld [vmem:[%s1264_s5 + $0x10] sm:$0xff]  ;;  %s781_s0 = sshll.u32 %s1270_s11, 4  ;;  %s782_s0 = int_to_ptr.hbm [resolvable:$true] %s781_s0 }
   0xb   :  { %157 = vmatpush.msra.mxu2 %v1076_v4  ;;  %227 = vmatpush.msra.mxu3 %v1076_v4  ;;  %v1105_v11 = vld [vmem:[#allocation3] sm:$0xff]  ;;  %v139_v12 = vld [vmem:[%s1260_s1] sm:$0x3]  ;;  %v99_v13 = vld [vmem:[%s1264_s5 + $0x8] sm:$0xff] }
   0xc   :  { %87 = vmatpush.msra.mxu0 %v59_v3  ;;  %833 = vmatpush.msra.mxu1 %v59_v3  ;;  %v98_v14 = vld [vmem:[%s1264_s5] sm:$0xff] }
   0xd   :  { %158 = vmatpush.msra.mxu2 %v1079_v5  ;;  %228 = vmatpush.msra.mxu3 %v1079_v5  ;;  %v843_v15 = vld [vmem:[%s1263_s4] ss:$0 sm:$0xff]  ;;  %s991_s4 = smov 64  }
   0xe   :  { %88 = vmatpush.msra.mxu0 %v58_v6  ;;  %834 = vmatpush.msra.mxu1 %v58_v6  ;;  %v1144_v22 = vld [vmem:[%s1266_s7] ss:$0 sm:$0xff] }
   0xf   :  { %809 = vmatmul.msk.f32.vlgmr.msra.gmra.mxu0 %vm66_vm0, %v56_v7  ;;  %810 = vmatmul.msk.f32.vlgmr.msra.gmra.mxu1 %vm66_vm0, %v57_v8  ;;  %v140_v28 = vld [vmem:[%s1261_s2] sm:$0x3]  ;;  %s993_s2 = smov 96  }
  0x10   :  { %124 = vmatpush.msrb.mxu1 %v101_v9  ;;  %451 = vmatpush.msrb.mxu0 %v1070_v2 }
  0x11   :  { %159 = vmatpush.msra.mxu2 %v1105_v11  ;;  %229 = vmatpush.msra.mxu3 %v1105_v11 }
  0x12   :  { %125 = vmatpush.msrb.mxu1 %v100_v10  ;;  %452 = vmatpush.msrb.mxu0 %v1076_v4 }
  0x13   :  { %813 = vmatmul.msk.f32.vlgmr.msra.gmra.mxu2 %vm66_vm0, %v139_v12  ;;  %376 = vmatpush.msrb.mxu3 %v1070_v2 }
  0x14   :  { %453 = vmatpush.msrb.mxu0 %v1079_v5  ;;  %126 = vmatpush.msrb.mxu1 %v99_v13 }
  0x15   :  { %301 = vmatpush.msrb.mxu2 %v1070_v2  ;;  %377 = vmatpush.msrb.mxu3 %v1076_v4 }
  0x16   :  { %454 = vmatpush.msrb.mxu0 %v1105_v11  ;;  %127 = vmatpush.msrb.mxu1 %v98_v14 }
  0x17   :  { %302 = vmatpush.msrb.mxu2 %v1076_v4  ;;  %378 = vmatpush.msrb.mxu3 %v1079_v5 }
  0x18   :  { %519 = vmatpush.msra.mxu1 %v1070_v2 }
  0x19   :  { %303 = vmatpush.msrb.mxu2 %v1079_v5  ;;  %379 = vmatpush.msrb.mxu3 %v1105_v11 }
  0x1a   :  { %520 = vmatpush.msra.mxu1 %v1076_v4 }
  0x1b   :  { %304 = vmatpush.msrb.mxu2 %v1105_v11 }
  0x1c   :  { %521 = vmatpush.msra.mxu1 %v1079_v5 }
  0x1d   :  { %593 = vmatpush.msra.mxu2 %v1070_v2 }
  0x1e   :  { %522 = vmatpush.msra.mxu1 %v1105_v11 }
  0x1f   :  { %594 = vmatpush.msra.mxu2 %v1076_v4 }
  0x21   :  { %595 = vmatpush.msra.mxu2 %v1079_v5 }
  0x23   :  { %596 = vmatpush.msra.mxu2 %v1105_v11 }
  0x8c   :  { %v90_v16 = vpop.f32.mrf.mxu0  ;;  %v93_v18 = vpop.f32.mrf.mxu1 }
  0x8d   :  { %v91_v17 = vadd.f32 %v843_v15, %v90_v16  ;;  %v94_v20 = vadd.f32 %v843_v15, %v93_v18 }
  0x8f   :  { %v96_v19 = vmax.f32 %v91_v17, 0.0  ;;  %v97_v21 = vmax.f32 %v94_v20, 0.0 }
  0x91   :  { %811 = vmatmul.msk.f32.vlgmr.msrb.gmra.mxu1 %vm66_vm0, %v96_v19 }
  0x96   :  { %v161_v24 = vpop.f32.mrf.mxu2 }
  0x99   :  { %812 = vmatmul.msk.f32.gmra.mxu1 %vm66_vm0, %v97_v21 }
 0x10e   :  { %v129_v23 = vpop.f32.mrf.mxu1 }
 0x10f   :  { %v1147_v25 = vadd.f32 %v1144_v22, %v129_v23 }
 0x111   :  { %v164_v26 = vadd.f32 %v161_v24, %v1147_v25 }
 0x113   :  { %846 = vtanh.f32 %v164_v26  ;;  %v814_v29 = vmul.f32 -1.442695, %v164_v26 }
 0x115   :  { %848 = vpow2.f32 %v814_v29 }
 0x119   :  { %v847_v27 = vpop.eup %846 }
 0x11a   :  { %191 = vrot.lane.b32.xlu0 %v847_v27, %s991_s4 }
 0x11b   :  { %v849_v30 = vpop.eup %848 }
 0x11c   :  { %v168_v31 = vadd.f32 1.0, %v849_v30 }
 0x11e   :  { %850 = vrcp.f32 %v168_v31  ;;  %v180_v37 = vand.u32 2147483648, %v168_v31  ;;  %vm174_vm2 = vweird.f32 %v168_v31  ;;  %v178_v38 = vand.u32 2147483647, %v168_v31 }
 0x120   :  { %v181_v40 = vor.u32 1.1754944e-38, %v180_v37  ;;  %vm179_vm4 = vcmp.eq.f32.partialorder %v178_v38, 8.507059e+37 }
 0x122   :  { %186 = vrot.lane.b32.xlu0 %v140_v28, %s992_s14 }
 0x124   :  { %v851_v32 = vpop.eup %850 }
 0x125   :  { %v170_v33 = vmul.f32 %v851_v32, %v168_v31  ;;  %vm175_vm1 = vweird.f32 %v851_v32 }
 0x126   :  { %vm176_vm3 = vmor %vm174_vm2, %vm175_vm1 }
 0x127   :  { %v171_v34 = vsub.f32 1.0, %v170_v33 }
 0x129   :  { %v172_v35 = vmul.f32 %v851_v32, %v171_v34 }
 0x12b   :  { %v173_v36 = vadd.f32 %v851_v32, %v172_v35 }
 0x12d   :  { %v177_v39 = vsel %vm176_vm3, %v851_v32, %v173_v36 }
 0x12e   :  { %v182_v42 = vsel %vm179_vm4, %v181_v40, %v177_v39 }
 0x18c   :  { %v192_v41 = vpop.permute.xlu0 %191 }
 0x18d   :  { %v194_v43 = vmul.f32 %v192_v41, %v182_v42 }
 0x18f   :  { %196 = vrot.lane.b32.xlu1 %v194_v43, %s992_s14 }
 0x194   :  { %v187_v44 = vpop.permute.xlu0 %186 }
 0x195   :  { %v189_v45 = vmul.f32 %v187_v44, %v182_v42 }
 0x201   :  { %v197_v46 = vpop.permute.xlu1 %196 }
 0x202   :  { %v199_v47 = vadd.f32 %v197_v46, %v189_v45 }
 0x204   :  { %852 = vtanh.f32 %v199_v47  ;;  %v259_v7 = vrot.slane %v199_v47, 6 }
 0x20a   :  { %v853_v48 = vpop.eup %852 }
 0x20b   :  { %202 = vrot.lane.b32.xlu1 %v853_v48, %s991_s4 }
 0x27d   :  { %v203_v49 = vpop.permute.xlu1 %202 }
 0x27e   :  { %v205_v50 = vmul.f32 %v203_v49, %v182_v42 }
 0x280   :  { %207 = vrot.lane.b32.xlu2 %v205_v50, %s992_s14 }
 0x2da   :  { %v208_v51 = vpop.permute.xlu2 %207 }
 0x2db   :  { %211 = vst.msk [vmem:[#allocation2] sm:$0x3] %vm210_vm5, %v208_v51  ;;  %815 = vmatmul.msk.f32.vlgmr.msra.gmra.mxu3 %vm66_vm0, %v208_v51 }
 0x2dc   :  { %667 = vmatpush.msra.mxu3 %v1070_v2 }
 0x2de   :  { %668 = vmatpush.msra.mxu3 %v1076_v4 }
 0x2e0   :  { %669 = vmatpush.msra.mxu3 %v1079_v5 }
 0x2e2   :  { %670 = vmatpush.msra.mxu3 %v1105_v11 }
 0x35e   :  { %v231_v52 = vpop.f32.mrf.mxu3 }
 0x35f   :  { %v235_v53 = vrot.slane %v231_v52, 6 }
 0x361   :  { %v237_v54 = vadd.f32 %v235_v53, %v1147_v25 }
 0x363   :  { %854 = vtanh.f32 %v237_v54  ;;  %v816_v56 = vmul.f32 -1.442695, %v237_v54 }
 0x365   :  { %856 = vpow2.f32 %v816_v56 }
 0x369   :  { %v855_v55 = vpop.eup %854 }
 0x36a   :  { %263 = vrot.lane.b32.xlu2 %v855_v55, %s991_s4 }
 0x36b   :  { %v857_v57 = vpop.eup %856 }
 0x36c   :  { %v241_v58 = vadd.f32 1.0, %v857_v57 }
 0x36e   :  { %858 = vrcp.f32 %v241_v58  ;;  %v253_v0 = vand.u32 2147483648, %v241_v58  ;;  %vm247_vm7 = vweird.f32 %v241_v58  ;;  %v251_v1 = vand.u32 2147483647, %v241_v58 }
 0x370   :  { %v254_v3 = vor.u32 1.1754944e-38, %v253_v0  ;;  %vm252_vm9 = vcmp.eq.f32.partialorder %v251_v1, 8.507059e+37 }
 0x374   :  { %v859_v59 = vpop.eup %858 }
 0x375   :  { %v243_v60 = vmul.f32 %v859_v59, %v241_v58  ;;  %vm248_vm6 = vweird.f32 %v859_v59 }
 0x376   :  { %vm249_vm8 = vmor %vm247_vm7, %vm248_vm6 }
 0x377   :  { %v244_v61 = vsub.f32 1.0, %v243_v60 }
 0x379   :  { %v245_v62 = vmul.f32 %v859_v59, %v244_v61 }
 0x37b   :  { %v246_v63 = vadd.f32 %v859_v59, %v245_v62 }
 0x37d   :  { %v250_v2 = vsel %vm249_vm8, %v859_v59, %v246_v63 }
 0x37e   :  { %v255_v5 = vsel %vm252_vm9, %v254_v3, %v250_v2 }
 0x37f   :  { %v261_v8 = vmul.f32 %v259_v7, %v255_v5 }
 0x3c4   :  { %v264_v4 = vpop.permute.xlu2 %263 }
 0x3c5   :  { %v266_v6 = vmul.f32 %v264_v4, %v255_v5 }
 0x3c7   :  { %268 = vrot.lane.b32.xlu0 %v266_v6, %s992_s14 }
 0x439   :  { %v269_v9 = vpop.permute.xlu0 %268 }
 0x43a   :  { %v271_v10 = vadd.f32 %v269_v9, %v261_v8  ;;  %v132_v9 = vpop.f32.mrf.mxu1 }
 0x43c   :  { %860 = vtanh.f32 %v271_v10  ;;  %v334_v37 = vrot.slane %v271_v10, 6  ;;  %v1192_v10 = vadd.f32 %v1144_v22, %v132_v9 }
 0x442   :  { %v861_v11 = vpop.eup %860 }
 0x443   :  { %274 = vrot.lane.b32.xlu1 %v861_v11, %s991_s4 }
 0x4b5   :  { %v275_v12 = vpop.permute.xlu1 %274 }
 0x4b6   :  { %v1168_v13 = vmul.f32 %v275_v12, %v255_v5 }
 0x4b8   :  { %v284_v14 = vrot.slane %v1168_v13, 2 }
 0x4ba   :  { %285 = vrot.lane.b32.xlu2 %v284_v14, %s992_s14 }
 0x514   :  { %v286_v15 = vpop.permute.xlu2 %285 }
 0x515   :  { %817 = vmatmul.msk.f32.vlgmr.msrb.gmra.mxu2 %vm66_vm0, %v286_v15 }
 0x598   :  { %v306_v16 = vpop.f32.mrf.mxu2 }
 0x599   :  { %v310_v17 = vrot.slane %v306_v16, 4 }
 0x59b   :  { %v312_v18 = vadd.f32 %v310_v17, %v1147_v25 }
 0x59d   :  { %862 = vtanh.f32 %v312_v18  ;;  %v818_v20 = vmul.f32 -1.442695, %v312_v18 }
 0x59f   :  { %864 = vpow2.f32 %v818_v20 }
 0x5a3   :  { %v863_v19 = vpop.eup %862 }
 0x5a4   :  { %338 = vrot.lane.b32.xlu0 %v863_v19, %s991_s4 }
 0x5a5   :  { %v865_v21 = vpop.eup %864 }
 0x5a6   :  { %v316_v23 = vadd.f32 1.0, %v865_v21 }
 0x5a8   :  { %866 = vrcp.f32 %v316_v23  ;;  %v328_v30 = vand.u32 2147483648, %v316_v23  ;;  %vm322_vm11 = vweird.f32 %v316_v23  ;;  %v326_v31 = vand.u32 2147483647, %v316_v23 }
 0x5aa   :  { %v329_v33 = vor.u32 1.1754944e-38, %v328_v30  ;;  %vm327_vm13 = vcmp.eq.f32.partialorder %v326_v31, 8.507059e+37 }
 0x5ae   :  { %v867_v24 = vpop.eup %866 }
 0x5af   :  { %v318_v26 = vmul.f32 %v867_v24, %v316_v23  ;;  %vm323_vm10 = vweird.f32 %v867_v24 }
 0x5b0   :  { %vm324_vm12 = vmor %vm322_vm11, %vm323_vm10 }
 0x5b1   :  { %v319_v27 = vsub.f32 1.0, %v318_v26 }
 0x5b3   :  { %v320_v28 = vmul.f32 %v867_v24, %v319_v27 }
 0x5b5   :  { %v321_v29 = vadd.f32 %v867_v24, %v320_v28 }
 0x5b7   :  { %v325_v32 = vsel %vm324_vm12, %v867_v24, %v321_v29 }
 0x5b8   :  { %v330_v35 = vsel %vm327_vm13, %v329_v33, %v325_v32 }
 0x5b9   :  { %v336_v38 = vmul.f32 %v334_v37, %v330_v35 }
 0x616   :  { %v339_v34 = vpop.permute.xlu0 %338 }
 0x617   :  { %v341_v36 = vmul.f32 %v339_v34, %v330_v35 }
 0x619   :  { %343 = vrot.lane.b32.xlu1 %v341_v36, %s992_s14 }
 0x68b   :  { %v344_v39 = vpop.permute.xlu1 %343 }
 0x68c   :  { %v346_v40 = vadd.f32 %v344_v39, %v336_v38 }
 0x68e   :  { %868 = vtanh.f32 %v346_v40  ;;  %v409_v0 = vrot.slane %v346_v40, 6 }
 0x694   :  { %v869_v41 = vpop.eup %868 }
 0x695   :  { %349 = vrot.lane.b32.xlu2 %v869_v41, %s991_s4 }
 0x6ef   :  { %v350_v42 = vpop.permute.xlu2 %349 }
 0x6f0   :  { %v1177_v43 = vmul.f32 %v350_v42, %v330_v35 }
 0x6f2   :  { %v359_v44 = vrot.slane %v1177_v43, 4 }
 0x6f4   :  { %360 = vrot.lane.b32.xlu0 %v359_v44, %s992_s14 }
 0x766   :  { %v361_v45 = vpop.permute.xlu0 %360 }
 0x767   :  { %819 = vmatmul.msk.f32.vlgmr.msrb.gmra.mxu3 %vm66_vm0, %v361_v45 }
 0x7ea   :  { %v381_v46 = vpop.f32.mrf.mxu3 }
 0x7eb   :  { %v385_v47 = vrot.slane %v381_v46, 2 }
 0x7ed   :  { %v387_v48 = vadd.f32 %v385_v47, %v1147_v25 }
 0x7ef   :  { %870 = vtanh.f32 %v387_v48  ;;  %v820_v50 = vmul.f32 -1.442695, %v387_v48 }
 0x7f1   :  { %872 = vpow2.f32 %v820_v50 }
 0x7f5   :  { %v871_v49 = vpop.eup %870 }
 0x7f6   :  { %413 = vrot.lane.b32.xlu1 %v871_v49, %s991_s4 }
 0x7f7   :  { %v873_v51 = vpop.eup %872 }
 0x7f8   :  { %v391_v52 = vadd.f32 1.0, %v873_v51 }
 0x7fa   :  { %874 = vrcp.f32 %v391_v52  ;;  %v403_v58 = vand.u32 2147483648, %v391_v52  ;;  %vm397_vm15 = vweird.f32 %v391_v52  ;;  %v401_v59 = vand.u32 2147483647, %v391_v52 }
 0x7fc   :  { %v404_v60 = vor.u32 1.1754944e-38, %v403_v58  ;;  %vm402_vm2 = vcmp.eq.f32.partialorder %v401_v59, 8.507059e+37 }
 0x800   :  { %v875_v53 = vpop.eup %874 }
 0x801   :  { %v393_v54 = vmul.f32 %v875_v53, %v391_v52  ;;  %vm398_vm14 = vweird.f32 %v875_v53 }
 0x802   :  { %vm399_vm1 = vmor %vm397_vm15, %vm398_vm14 }
 0x803   :  { %v394_v55 = vsub.f32 1.0, %v393_v54 }
 0x805   :  { %v395_v56 = vmul.f32 %v875_v53, %v394_v55 }
 0x807   :  { %v396_v57 = vadd.f32 %v875_v53, %v395_v56 }
 0x809   :  { %v400_v25 = vsel %vm399_vm1, %v875_v53, %v396_v57 }
 0x80a   :  { %v405_v62 = vsel %vm402_vm2, %v404_v60, %v400_v25 }
 0x80b   :  { %v411_v1 = vmul.f32 %v409_v0, %v405_v62 }
 0x868   :  { %v414_v61 = vpop.permute.xlu1 %413 }
 0x869   :  { %v416_v63 = vmul.f32 %v414_v61, %v405_v62 }
 0x86b   :  { %418 = vrot.lane.b32.xlu2 %v416_v63, %s992_s14 }
 0x8c5   :  { %v419_v2 = vpop.permute.xlu2 %418 }
 0x8c6   :  { %v421_v3 = vadd.f32 %v419_v2, %v411_v1 }
 0x8c8   :  { %876 = vtanh.f32 %v421_v3  ;;  %v481_v31 = vrot.slane %v421_v3, 6 }
 0x8ce   :  { %v877_v4 = vpop.eup %876 }
 0x8cf   :  { %424 = vrot.lane.b32.xlu0 %v877_v4, %s991_s4 }
 0x941   :  { %v425_v5 = vpop.permute.xlu0 %424 }
 0x942   :  { %v1186_v6 = vmul.f32 %v425_v5, %v405_v62 }
 0x944   :  { %v434_v7 = vrot.slane %v1186_v6, 6 }
 0x946   :  { %435 = vrot.lane.b32.xlu1 %v434_v7, %s992_s14 }
 0x9b8   :  { %v436_v8 = vpop.permute.xlu1 %435 }
 0x9b9   :  { %821 = vmatmul.msk.f32.vlgmr.msrb.gmra.mxu0 %vm66_vm0, %v436_v8 }
 0xa36   :  { %v456_v11 = vpop.f32.mrf.mxu0 }
 0xa37   :  { %v459_v12 = vadd.f32 %v456_v11, %v1192_v10 }
 0xa39   :  { %878 = vtanh.f32 %v459_v12  ;;  %v822_v15 = vmul.f32 -1.442695, %v459_v12 }
 0xa3b   :  { %880 = vpow2.f32 %v822_v15 }
 0xa3f   :  { %v879_v14 = vpop.eup %878 }
 0xa40   :  { %485 = vrot.lane.b32.xlu2 %v879_v14, %s991_s4 }
 0xa41   :  { %v881_v16 = vpop.eup %880 }
 0xa42   :  { %v463_v17 = vadd.f32 1.0, %v881_v16 }
 0xa44   :  { %882 = vrcp.f32 %v463_v17  ;;  %v475_v22 = vand.u32 2147483648, %v463_v17  ;;  %vm469_vm4 = vweird.f32 %v463_v17  ;;  %v473_v24 = vand.u32 2147483647, %v463_v17 }
 0xa46   :  { %v476_v27 = vor.u32 1.1754944e-38, %v475_v22  ;;  %vm474_vm7 = vcmp.eq.f32.partialorder %v473_v24, 8.507059e+37 }
 0xa4a   :  { %v883_v18 = vpop.eup %882 }
 0xa4b   :  { %v465_v19 = vmul.f32 %v883_v18, %v463_v17  ;;  %vm470_vm3 = vweird.f32 %v883_v18 }
 0xa4c   :  { %vm471_vm6 = vmor %vm469_vm4, %vm470_vm3  ;;  %vm282_vm4 = vcmask 257026  }
 0xa4d   :  { %v466_v20 = vsub.f32 1.0, %v465_v19 }
 0xa4f   :  { %v467_v21 = vmul.f32 %v883_v18, %v466_v20 }
 0xa51   :  { %v468_v23 = vadd.f32 %v883_v18, %v467_v21 }
 0xa53   :  { %v472_v26 = vsel %vm471_vm6, %v883_v18, %v468_v23  ;;  %vm357_vm6 = vcmask 259076  }
 0xa54   :  { %v477_v29 = vsel %vm474_vm7, %v476_v27, %v472_v26  ;;  %vm432_vm7 = vcmask 261126  }
 0xa55   :  { %v483_v32 = vmul.f32 %v481_v31, %v477_v29 }
 0xa9a   :  { %v486_v28 = vpop.permute.xlu2 %485 }
 0xa9b   :  { %v488_v30 = vmul.f32 %v486_v28, %v477_v29 }
 0xa9d   :  { %490 = vrot.lane.b32.xlu0 %v488_v30, %s992_s14 }
 0xb0f   :  { %v491_v33 = vpop.permute.xlu0 %490 }
 0xb10   :  { %v493_v34 = vadd.f32 %v491_v33, %v483_v32 }
 0xb12   :  { %884 = vtanh.f32 %v493_v34  ;;  %v552_v59 = vrot.slane %v493_v34, 6 }
 0xb18   :  { %v885_v35 = vpop.eup %884 }
 0xb19   :  { %496 = vrot.lane.b32.xlu1 %v885_v35, %s991_s4 }
 0xb8b   :  { %v497_v36 = vpop.permute.xlu1 %496 }
 0xb8c   :  { %v499_v37 = vmul.f32 %v497_v36, %v477_v29 }
 0xb8e   :  { %501 = vrot.lane.b32.xlu2 %v499_v37, %s992_s14 }
 0xbe8   :  { %v502_v38 = vpop.permute.xlu2 %501 }
 0xbe9   :  { %504 = vst.msk [vmem:[#allocation2 + $0x8] sm:$0x3] %vm210_vm5, %v502_v38  ;;  %823 = vmatmul.msk.f32.vlgmr.msra.gmra.mxu1 %vm66_vm0, %v502_v38 }
 0xc66   :  { %v524_v39 = vpop.f32.mrf.mxu1 }
 0xc67   :  { %v528_v40 = vrot.slane %v524_v39, 6 }
 0xc69   :  { %v530_v41 = vadd.f32 %v528_v40, %v1192_v10 }
 0xc6b   :  { %886 = vtanh.f32 %v530_v41  ;;  %v824_v44 = vmul.f32 -1.442695, %v530_v41 }
 0xc6d   :  { %888 = vpow2.f32 %v824_v44 }
 0xc71   :  { %v887_v42 = vpop.eup %886 }
 0xc72   :  { %556 = vrot.lane.b32.xlu0 %v887_v42, %s991_s4 }
 0xc73   :  { %v889_v45 = vpop.eup %888 }
 0xc74   :  { %v534_v46 = vadd.f32 1.0, %v889_v45 }
 0xc76   :  { %890 = vrcp.f32 %v534_v46  ;;  %v546_v52 = vand.u32 2147483648, %v534_v46  ;;  %vm540_vm8 = vweird.f32 %v534_v46  ;;  %v544_v53 = vand.u32 2147483647, %v534_v46 }
 0xc78   :  { %v547_v55 = vor.u32 1.1754944e-38, %v546_v52  ;;  %vm545_vm10 = vcmp.eq.f32.partialorder %v544_v53, 8.507059e+37 }
 0xc7c   :  { %v891_v47 = vpop.eup %890 }
 0xc7d   :  { %v536_v48 = vmul.f32 %v891_v47, %v534_v46  ;;  %vm541_vm5 = vweird.f32 %v891_v47 }
 0xc7e   :  { %vm542_vm9 = vmor %vm540_vm8, %vm541_vm5  ;;  %vm763_vm5 = vcmask 31744  }
 0xc7f   :  { %v537_v49 = vsub.f32 1.0, %v536_v48 }
 0xc81   :  { %v538_v50 = vmul.f32 %v891_v47, %v537_v49 }
 0xc83   :  { %v539_v51 = vadd.f32 %v891_v47, %v538_v50 }
 0xc85   :  { %v543_v54 = vsel %vm542_vm9, %v891_v47, %v539_v51 }
 0xc86   :  { %v548_v57 = vsel %vm545_vm10, %v547_v55, %v543_v54 }
 0xc87   :  { %v554_v25 = vmul.f32 %v552_v59, %v548_v57 }
 0xce4   :  { %v557_v56 = vpop.permute.xlu0 %556 }
 0xce5   :  { %v559_v58 = vmul.f32 %v557_v56, %v548_v57 }
 0xce7   :  { %561 = vrot.lane.b32.xlu1 %v559_v58, %s992_s14 }
 0xd59   :  { %v562_v60 = vpop.permute.xlu1 %561 }
 0xd5a   :  { %v564_v61 = vadd.f32 %v562_v60, %v554_v25 }
 0xd5c   :  { %892 = vtanh.f32 %v564_v61  ;;  %v626_v26 = vrot.slane %v564_v61, 6  ;;  %v729_v61 = vld [vmem:[%s1267_s8 + $0x18] sm:$0xff] }
 0xd5d   :  { %752 = vmatpush.msra.mxu0 %v729_v61 }
 0xd62   :  { %v893_v62 = vpop.eup %892 }
 0xd63   :  { %567 = vrot.lane.b32.xlu2 %v893_v62, %s991_s4  ;;  %v728_v62 = vld [vmem:[%s1267_s8 + $0x10] sm:$0xff] }
 0xd64   :  { %753 = vmatpush.msra.mxu0 %v728_v62 }
 0xdbd   :  { %v568_v63 = vpop.permute.xlu2 %567 }
 0xdbe   :  { %v570_v0 = vmul.f32 %v568_v63, %v548_v57  ;;  %v727_v63 = vld [vmem:[%s1267_s8 + $0x8] sm:$0xff] }
 0xdbf   :  { %754 = vmatpush.msra.mxu0 %v727_v63 }
 0xdc0   :  { %v576_v1 = vrot.slane %v570_v0, 2 }
 0xdc2   :  { %577 = vrot.lane.b32.xlu0 %v576_v1, %s992_s14 }
 0xe34   :  { %v578_v2 = vpop.permute.xlu0 %577 }
 0xe35   :  { %825 = vmatmul.msk.f32.vlgmr.msra.gmra.mxu2 %vm66_vm0, %v578_v2 }
 0xeb8   :  { %v598_v3 = vpop.f32.mrf.mxu2 }
 0xeb9   :  { %v602_v4 = vrot.slane %v598_v3, 4 }
 0xebb   :  { %v604_v5 = vadd.f32 %v602_v4, %v1192_v10 }
 0xebd   :  { %894 = vtanh.f32 %v604_v5  ;;  %v826_v8 = vmul.f32 -1.442695, %v604_v5 }
 0xebf   :  { %896 = vpow2.f32 %v826_v8 }
 0xec3   :  { %v895_v7 = vpop.eup %894 }
 0xec4   :  { %630 = vrot.lane.b32.xlu1 %v895_v7, %s991_s4  ;;  %v845_v7 = vld [vmem:[%s1268_s9] ss:$0 sm:$0xff] }
 0xec5   :  { %v897_v9 = vpop.eup %896 }
 0xec6   :  { %v608_v11 = vadd.f32 1.0, %v897_v9 }
 0xec8   :  { %898 = vrcp.f32 %v608_v11  ;;  %v620_v18 = vand.u32 2147483648, %v608_v11  ;;  %vm614_vm12 = vweird.f32 %v608_v11  ;;  %v618_v19 = vand.u32 2147483647, %v608_v11 }
 0xeca   :  { %v621_v21 = vor.u32 1.1754944e-38, %v620_v18  ;;  %vm619_vm14 = vcmp.eq.f32.partialorder %v618_v19, 8.507059e+37 }
 0xece   :  { %v899_v12 = vpop.eup %898 }
 0xecf   :  { %v610_v14 = vmul.f32 %v899_v12, %v608_v11  ;;  %vm615_vm11 = vweird.f32 %v899_v12 }
 0xed0   :  { %vm616_vm13 = vmor %vm614_vm12, %vm615_vm11 }
 0xed1   :  { %v611_v15 = vsub.f32 1.0, %v610_v14 }
 0xed3   :  { %v612_v16 = vmul.f32 %v899_v12, %v611_v15 }
 0xed5   :  { %v613_v17 = vadd.f32 %v899_v12, %v612_v16 }
 0xed7   :  { %v617_v20 = vsel %vm616_vm13, %v899_v12, %v613_v17 }
 0xed8   :  { %v622_v22 = vsel %vm619_vm14, %v621_v21, %v617_v20 }
 0xed9   :  { %v628_v27 = vmul.f32 %v626_v26, %v622_v22 }
 0xf36   :  { %v631_v23 = vpop.permute.xlu1 %630 }
 0xf37   :  { %v633_v24 = vmul.f32 %v631_v23, %v622_v22 }
 0xf39   :  { %635 = vrot.lane.b32.xlu2 %v633_v24, %s992_s14 }
 0xf93   :  { %v636_v28 = vpop.permute.xlu2 %635 }
 0xf94   :  { %v638_v29 = vadd.f32 %v636_v28, %v628_v27 }
 0xf96   :  { %900 = vtanh.f32 %v638_v29  ;;  %v700_v55 = vrot.slane %v638_v29, 6 }
 0xf9c   :  { %v901_v30 = vpop.eup %900 }
 0xf9d   :  { %641 = vrot.lane.b32.xlu0 %v901_v30, %s991_s4 }
0x100f   :  { %v642_v31 = vpop.permute.xlu0 %641 }
0x1010   :  { %v644_v32 = vmul.f32 %v642_v31, %v622_v22 }
0x1012   :  { %v650_v33 = vrot.slane %v644_v32, 4 }
0x1014   :  { %651 = vrot.lane.b32.xlu1 %v650_v33, %s992_s14 }
0x1086   :  { %v652_v34 = vpop.permute.xlu1 %651 }
0x1087   :  { %827 = vmatmul.msk.f32.vlgmr.msra.gmra.mxu3 %vm66_vm0, %v652_v34 }
0x110a   :  { %v672_v35 = vpop.f32.mrf.mxu3 }
0x110b   :  { %v676_v36 = vrot.slane %v672_v35, 2 }
0x110d   :  { %v678_v37 = vadd.f32 %v676_v36, %v1192_v10 }
0x110f   :  { %902 = vtanh.f32 %v678_v37  ;;  %v828_v39 = vmul.f32 -1.442695, %v678_v37 }
0x1111   :  { %904 = vpow2.f32 %v828_v39 }
0x1115   :  { %v903_v38 = vpop.eup %902 }
0x1116   :  { %704 = vrot.lane.b32.xlu2 %v903_v38, %s991_s4 }
0x1117   :  { %v905_v40 = vpop.eup %904 }
0x1118   :  { %v682_v41 = vadd.f32 1.0, %v905_v40 }
0x111a   :  { %906 = vrcp.f32 %v682_v41  ;;  %v694_v10 = vand.u32 2147483648, %v682_v41  ;;  %vm688_vm1 = vweird.f32 %v682_v41  ;;  %v692_v48 = vand.u32 2147483647, %v682_v41 }
0x111c   :  { %v695_v50 = vor.u32 1.1754944e-38, %v694_v10  ;;  %vm693_vm3 = vcmp.eq.f32.partialorder %v692_v48, 8.507059e+37 }
0x111e   :  { %279 = vrot.lane.b32.xlu2 %v1168_v13, %s992_s14 }
0x1120   :  { %v907_v42 = vpop.eup %906 }
0x1121   :  { %v684_v44 = vmul.f32 %v907_v42, %v682_v41  ;;  %vm689_vm15 = vweird.f32 %v907_v42 }
0x1122   :  { %vm690_vm2 = vmor %vm688_vm1, %vm689_vm15 }
0x1123   :  { %v685_v45 = vsub.f32 1.0, %v684_v44 }
0x1125   :  { %v686_v46 = vmul.f32 %v907_v42, %v685_v45 }
0x1126   :  { %572 = vrot.lane.b32.xlu2 %v570_v0, %s992_s14 }
0x1127   :  { %v687_v47 = vadd.f32 %v907_v42, %v686_v46 }
0x1129   :  { %v691_v49 = vsel %vm690_vm2, %v907_v42, %v687_v47 }
0x112a   :  { %v696_v51 = vsel %vm693_vm3, %v695_v50, %v691_v49 }
0x112b   :  { %v702_v56 = vmul.f32 %v700_v55, %v696_v51 }
0x1170   :  { %v705_v13 = vpop.permute.xlu2 %704 }
0x1171   :  { %v707_v52 = vmul.f32 %v705_v13, %v696_v51 }
0x1173   :  { %709 = vrot.lane.b32.xlu0 %v707_v52, %s992_s14 }
0x1178   :  { %v280_v53 = vpop.permute.xlu2 %279 }
0x1179   :  { %283 = vst.msk [vmem:[#allocation2] sm:$0xc] %vm282_vm4, %v280_v53 }
0x117b   :  { %354 = vrot.lane.b32.xlu0 %v1177_v43, %s992_s14 }
0x1180   :  { %v573_v54 = vpop.permute.xlu2 %572 }
0x1181   :  { %575 = vst.msk [vmem:[#allocation2 + $0x8] sm:$0xc] %vm282_vm4, %v573_v54 }
0x1183   :  { %646 = vrot.lane.b32.xlu0 %v644_v32, %s992_s14 }
0x11e5   :  { %v710_v57 = vpop.permute.xlu0 %709 }
0x11e6   :  { %v712_v58 = vadd.f32 %v710_v57, %v702_v56 }
0x11e8   :  { %908 = vtanh.f32 %v712_v58  ;;  %768 = vrot.lane.b32.xlu2 %v712_v58, %s993_s2 }
0x11ed   :  { %v355_v59 = vpop.permute.xlu0 %354 }
0x11ee   :  { %v909_v25 = vpop.eup %908  ;;  %358 = vst.msk [vmem:[#allocation2] sm:$0x30] %vm357_vm6, %v355_v59 }
0x11ef   :  { %715 = vrot.lane.b32.xlu1 %v909_v25, %s991_s4 }
0x11f5   :  { %v647_v60 = vpop.permute.xlu0 %646 }
0x11f6   :  { %649 = vst.msk [vmem:[#allocation2 + $0x8] sm:$0x30] %vm357_vm6, %v647_v60 }
0x11f7   :  { %429 = vrot.lane.b32.xlu1 %v1186_v6, %s992_s14  ;;  %v726_v6 = vld [vmem:[%s1267_s8] sm:$0xff]  ;;  %s779_s8 = sshll.u32 %s994_s22, 4  ;;  %s780_s8 = int_to_ptr.vmem [resolvable:$true] %s779_s8 }
0x11f8   :  { %755 = vmatpush.msra.mxu0 %v726_v6 }
0x1242   :  { %v769_v43 = vpop.permute.xlu2 %768 }
0x1243   :  { %771 = vst.msk [vmem:[#allocation7 - $0x6] sm:$0xc0] %vm432_vm7, %v769_v43 }
0x1244   :  { %795 = dma.vmem_to_hbm [thread:$0]  %s791_s25, 32, %s793_s28, [#allocation8]  }
0x1261   :  { %v716_v0 = vpop.permute.xlu1 %715 }
0x1262   :  { %v718_v1 = vmul.f32 %v716_v0, %v696_v51 }
0x1264   :  { %720 = vrot.lane.b32.xlu1 %v718_v1, %s992_s14 }
0x1269   :  { %v430_v2 = vpop.permute.xlu1 %429 }
0x126a   :  { %433 = vst.msk [vmem:[#allocation2] sm:$0xc0] %vm432_vm7, %v430_v2 }
0x1271   :  { %v724_v3 = vld [vmem:[#allocation2] sm:$0xff] }
0x1272   :  { %829 = vmatmul.msk.f32.vlgmr.msra.gmra.mxu0 %vm66_vm0, %v724_v3 }
0x12d6   :  { %v721_v4 = vpop.permute.xlu1 %720 }
0x12d7   :  { %723 = vst.msk [vmem:[#allocation2 + $0x8] sm:$0xc0] %vm432_vm7, %v721_v4 }
0x12d8   :  { %766 = vst.msk [vmem:[#allocation6 - $0x6] sm:$0xc0] %vm432_vm7, %v721_v4 }
0x12d9   :  { %784 = dma.vmem_to_hbm [thread:$0]  %s780_s8, 32, %s782_s0, [#allocation5]  }
0x12de   :  { %v725_v5 = vld [vmem:[#allocation2 + $0x8] sm:$0xff] }
0x12df   :  { %830 = vmatmul.msk.f32.gmra.mxu0 %vm66_vm0, %v725_v5 }
0x12ef   :  { %v757_v8 = vpop.f32.mrf.mxu0 }
0x12f0   :  { %v758_v9 = vadd.f32 %v845_v7, %v757_v8 }
0x12f2   :  { %764 = vst.msk [vmem:[%s1269_s10] sm:$0xff] %vm763_vm5, %v758_v9 }
0x135c   :  { %v760_v11 = vpop.f32.mrf.mxu0 }
0x135d   :  { %v761_v12 = vadd.f32 %v845_v7, %v760_v11 }
0x135f   :  { %765 = vst.msk [vmem:[%s1269_s10 + $0x8] sm:$0xff] %vm763_vm5, %v761_v12 }
0x1360   :  { %984 = dma.done.wait [#allocation5], 32  }
0x1361   :  { %985 = vsyncadd [#allocation5], 4294967264 }
0x1362   :  { %986 = dma.done.wait [#allocation8], 32  }
0x1363   :  { %987 = vsyncadd [#allocation8], 4294967264 }
0x1364   :  { %806 = vsyncpa [#allocation4], 1 }
0x1365   :  { %807 = vsyncpa [#allocation5], 1 }
0x1366   :  { %808 = vsyncpa [#allocation8], 1 }

</bundles_post_ra>
